<compile_context>
chip_gen: v5e
topology: v5e:2x2
jax: 0.10.0
libtpu: 0.0.40
codegen_flags: <defaults>
</compile_context>

<pallas_src>
import functools

import jax
import jax.numpy as jnp
from jax import lax
from jax.experimental import pallas as pl
from jax.experimental.pallas import tpu as pltpu


def _round_up(x: int, m: int) -> int:
    return ((x + m - 1) // m) * m


def _cdiv(a: int, b: int) -> int:
    return (a + b - 1) // b


# --------------------------------------------------------------------------
# Per-generation tuning: (per-step VMEM budget, explicit vmem_limit_bytes or
# None, number of TensorCores sharing the grid).
# --------------------------------------------------------------------------
def _chip_profile():
    kind = ""
    try:
        kind = jax.devices()[0].device_kind.lower()
    except Exception:
        pass
    if ("v5 lite" in kind) or ("v5e" in kind) or ("v5lite" in kind):
        return 14 * 2**20, 64 * 2**20, 1          # v5e: 1 TC, 128 MiB VMEM
    if ("v6 lite" in kind) or ("v6e" in kind) or ("v6lite" in kind):
        return 32 * 2**20, 96 * 2**20, 1          # v6e: 1 TC, 128 MiB VMEM
    if ("v7" in kind) or ("tpu7" in kind):
        return 24 * 2**20, 44 * 2**20, 2          # v7x: 2 TCs, 64 MiB VMEM/TC
    # Unknown generation: conservative defaults (same behavior as before).
    return 8 * 2**20, None, 1


# --------------------------------------------------------------------------
# Interpolation matrices (align_corners=True), pad rows/cols are zero.
# --------------------------------------------------------------------------
def _bilinear_matrix_align_corners(out_size: int, in_size: int) -> jnp.ndarray:
    """R (out_size, in_size): y_out = R @ y_in, matching
    nn.Upsample(mode='bilinear', align_corners=True) along one axis."""
    if in_size == 1:
        return jnp.ones((out_size, 1), dtype=jnp.float32)
    i = jnp.arange(out_size, dtype=jnp.float32)
    src = i * (in_size - 1) / (out_size - 1)
    lo = jnp.clip(jnp.floor(src).astype(jnp.int32), 0, in_size - 1)
    hi = jnp.clip(lo + 1, 0, in_size - 1)
    w_hi = src - lo.astype(jnp.float32)
    w_lo = 1.0 - w_hi
    rows = jnp.arange(out_size)
    R = jnp.zeros((out_size, in_size), dtype=jnp.float32)
    R = R.at[rows, lo].add(w_lo)
    R = R.at[rows, hi].add(w_hi)
    return R


def _pad_matrix(R: jnp.ndarray, pad_before: int, pad_after: int) -> jnp.ndarray:
    return jnp.pad(R, ((pad_before, pad_after), (0, 0)))


# --------------------------------------------------------------------------
# Block-size / grid selection.
# --------------------------------------------------------------------------
def _kron_block_rows(nc: int, kp: int, np_: int, itemsize: int, budget: int) -> int:
    """Channel rows per grid step for the fused-kron kernel (multiple of 8)."""
    kp_l = _round_up(kp, 128)
    np_l = _round_up(np_, 128)
    fixed = 2 * _round_up(kp, 8) * np_l * 4                       # MT buffers
    per_row = (2 * kp_l + 2 * np_l) * itemsize + np_l * 4         # in/out (2x) + f32 acc
    avail = max(budget - fixed, 8 * per_row)
    b = (avail // per_row) // 8 * 8
    return int(min(max(8, b), _round_up(nc, 8)))


def _sep_block_rows(nc: int, h: int, w: int, h2: int, w2: int,
                    itemsize: int, budget: int) -> int:
    """Channel slices per grid step for the separable fallback kernel."""
    slice_bytes = (
        2 * _round_up(h, 8) * _round_up(w, 128) * itemsize        # input (2x buffered)
        + 2 * _round_up(h2, 8) * _round_up(w2, 128) * itemsize    # output (2x buffered)
        + _round_up(h, 8) * _round_up(w2, 128) * 4                # f32 intermediate
        + _round_up(h2, 8) * _round_up(w2, 128) * 4               # f32 result temp
        + _round_up(h2, 8) * _round_up(h, 128) * 4                # broadcast Ry
    )
    return int(max(1, min(budget // slice_bytes, nc)))


def _pick_grid(nc: int, b_max: int, n_tc: int) -> int:
    """Number of grid steps; force an even >=2 split only on 2-TC chips."""
    n = max(1, _cdiv(nc, b_max))
    if n_tc >= 2 and nc >= 2:
        if n < 2:
            n = 2
        elif n % 2:
            n += 1
    return n


# --------------------------------------------------------------------------
# Kernels.
# --------------------------------------------------------------------------
def _up_kron_kernel(x_ref, mt_ref, o_ref):
    # x_ref: (B, H*W)   mt_ref: (H*W, H2*W2)   o_ref: (B, H2*W2)
    # One lane-dense MXU matmul per grid step; the f32 accumulator is cast
    # once at the store.
    o_ref[...] = jnp.dot(
        x_ref[...], mt_ref[...], preferred_element_type=jnp.float32
    ).astype(o_ref.dtype)


def _up_separable_kernel(x_ref, ry_ref, rxT_ref, o_ref):
    # x_ref: (B, H, W)  ry_ref: (H2, H)  rxT_ref: (W, W2)  o_ref: (B, H2, W2)
    B, H, W = x_ref.shape
    H2 = ry_ref.shape[0]
    W2 = rxT_ref.shape[1]

    x = x_ref[...]
    # W-axis upsample + left/right zero pad, channels folded into the MXU M
    # dim.  No preferred_element_type: bf16 in -> bf16 out of the MXU (no
    # extra VPU cast pass), f32 in -> f32 out.
    t = jnp.dot(x.reshape(B * H, W), rxT_ref[...]).reshape(B, H, W2)

    # H-axis upsample + top/bottom zero pad as a batched matmul.  This path is
    # only taken for large spatial sizes, where B is small and each
    # (H2, H) @ (H, W2) is full-size MXU work, so the Ry broadcast is tiny
    # (the small-spatial regime uses the fused kron kernel instead).
    ry_b = jnp.broadcast_to(ry_ref[...], (B, H2, H))
    out = lax.dot_general(
        ry_b, t,
        dimension_numbers=(((2,), (1,)), ((0,), (0,))),
        preferred_element_type=jnp.float32)
    o_ref[...] = out.astype(o_ref.dtype)


# --------------------------------------------------------------------------
# Wrapper.
# --------------------------------------------------------------------------
_KRON_VMEM_CAP = 2 * 2**20   # use the fused path while kron(Ry, Rx) stays small


@functools.partial(jax.jit, static_argnames=("target_h", "target_w"))
def up_forward(x1: jnp.ndarray, *, target_h: int, target_w: int) -> jnp.ndarray:
    """Equivalent of Up().forward(x1, x2) where x2 has spatial (target_h, target_w)."""
    N, C, H, W = x1.shape
    H_up, W_up = 2 * H, 2 * W
    diffY = target_h - H_up
    diffX = target_w - W_up
    assert diffY >= 0 and diffX >= 0, "x2 spatial dims must be >= upsampled x1"
    pad_top, pad_bot = diffY // 2, diffY - diffY // 2
    pad_lft, pad_rgt = diffX // 2, diffX - diffX // 2
    H2, W2 = target_h, target_w

    # Keep the matmul weights in bf16 for bf16 inputs (bf16 MXU path), else f32.
    w_dtype = jnp.bfloat16 if x1.dtype == jnp.bfloat16 else jnp.float32
    w_item = jnp.dtype(w_dtype).itemsize
    itemsize = jnp.dtype(x1.dtype).itemsize

    Ry = _pad_matrix(_bilinear_matrix_align_corners(H_up, H), pad_top, pad_bot)  # (H2, H)
    Rx = _pad_matrix(_bilinear_matrix_align_corners(W_up, W), pad_lft, pad_rgt)  # (W2, W)

    NC = N * C
    budget, vmem_limit, n_tc = _chip_profile()
    cp_kwargs = dict(dimension_semantics=("parallel",))
    if vmem_limit is not None:
        cp_kwargs["vmem_limit_bytes"] = int(vmem_limit)
    cparams = pltpu.CompilerParams(**cp_kwargs)

    use_kron = (H * W) * (H2 * W2) * w_item <= _KRON_VMEM_CAP

    if use_kron:
        # ---- fused Kronecker path: one lane-dense matmul per grid step ----
        Kp, Np = H * W, H2 * W2
        # MT[(h*W+w), (h2*W2+w2)] = Ry[h2, h] * Rx[w2, w]
        MT = jnp.einsum("uh,vw->hwuv", Ry, Rx).reshape(Kp, Np).astype(w_dtype)

        b_max = _kron_block_rows(NC, Kp, Np, itemsize, budget)
        n_blocks = _pick_grid(NC, b_max, n_tc)
        B = _round_up(_cdiv(NC, n_blocks), 8)
        NC_pad = B * n_blocks

        x_flat = x1.reshape(NC, Kp)                       # metadata-only reshape
        if NC_pad != NC:
            x_flat = jnp.pad(x_flat, ((0, NC_pad - NC), (0, 0)))

        cost = pl.CostEstimate(
            flops=2 * NC_pad * Kp * Np, transcendentals=0,
            bytes_accessed=NC_pad * (Kp + Np) * itemsize + Kp * Np * w_item)

        out_flat = pl.pallas_call(
            _up_kron_kernel,
            out_shape=jax.ShapeDtypeStruct((NC_pad, Np), x1.dtype),
            grid_spec=pltpu.PrefetchScalarGridSpec(
                num_scalar_prefetch=0,
                grid=(n_blocks,),
                in_specs=[
                    pl.BlockSpec((B, Kp), lambda i: (i, 0)),
                    pl.BlockSpec((Kp, Np), lambda i: (0, 0)),
                ],
                out_specs=pl.BlockSpec((B, Np), lambda i: (i, 0)),
            ),
            compiler_params=cparams,
            cost_estimate=cost,
        )(x_flat, MT)

        if NC_pad != NC:
            out_flat = out_flat[:NC]
        return out_flat.reshape(N, C, H2, W2)             # metadata-only reshape

    # ---- separable fallback (large spatial sizes) ----
    Ry_w = Ry.astype(w_dtype)                              # (H2, H)
    RxT_w = Rx.T.astype(w_dtype)                           # (W, W2)

    b_max = _sep_block_rows(NC, H, W, H2, W2, itemsize, budget)
    n_blocks = _pick_grid(NC, b_max, n_tc)
    B = _cdiv(NC, n_blocks)
    NC_pad = B * n_blocks

    x_flat = x1.reshape(NC, H, W)
    if NC_pad != NC:
        x_flat = jnp.pad(x_flat, ((0, NC_pad - NC), (0, 0), (0, 0)))

    cost = pl.CostEstimate(
        flops=2 * NC_pad * (H * W * W2 + H2 * H * W2), transcendentals=0,
        bytes_accessed=NC_pad * (H * W + H2 * W2) * itemsize
        + (H2 * H + W * W2) * w_item)

    out_flat = pl.pallas_call(
        _up_separable_kernel,
        out_shape=jax.ShapeDtypeStruct((NC_pad, H2, W2), x1.dtype),
        grid_spec=pltpu.PrefetchScalarGridSpec(
            num_scalar_prefetch=0,
            grid=(n_blocks,),
            in_specs=[
                pl.BlockSpec((B, H, W), lambda i: (i, 0, 0)),
                pl.BlockSpec((H2, H), lambda i: (0, 0)),
                pl.BlockSpec((W, W2), lambda i: (0, 0)),
            ],
            out_specs=pl.BlockSpec((B, H2, W2), lambda i: (i, 0, 0)),
        ),
        compiler_params=cparams,
        cost_estimate=cost,
    )(x_flat, Ry_w, RxT_w)

    if NC_pad != NC:
        out_flat = out_flat[:NC]
    return out_flat.reshape(N, C, H2, W2)


# --------------------------------------------------------------------------
# Pure-JAX reference (gather-based bilinear, align_corners=True) + jnp.pad.
# --------------------------------------------------------------------------
def up_reference(x1: jnp.ndarray, target_h: int, target_w: int) -> jnp.ndarray:
    N, C, H, W = x1.shape
    H_up, W_up = 2 * H, 2 * W

    def axis_coords(out_size, in_size):
        if in_size == 1:
            z = jnp.zeros((out_size,), jnp.int32)
            return z, z, jnp.zeros((out_size,), jnp.float32)
        i = jnp.arange(out_size, dtype=jnp.float32)
        src = i * (in_size - 1) / (out_size - 1)
        lo = jnp.clip(jnp.floor(src).astype(jnp.int32), 0, in_size - 1)
        hi = jnp.clip(lo + 1, 0, in_size - 1)
        return lo, hi, src - lo.astype(jnp.float32)

    y0, y1, wy = axis_coords(H_up, H)
    x0, x1i, wx = axis_coords(W_up, W)
    xf = x1.astype(jnp.float32)
    top = (xf[:, :, y0, :] * (1 - wy)[None, None, :, None]
           + xf[:, :, y1, :] * wy[None, None, :, None])
    out = (top[:, :, :, x0] * (1 - wx)[None, None, None, :]
           + top[:, :, :, x1i] * wx[None, None, None, :])
    diffY, diffX = target_h - H_up, target_w - W_up
    out = jnp.pad(out, ((0, 0), (0, 0),
                        (diffY // 2, diffY - diffY // 2),
                        (diffX // 2, diffX - diffX // 2)))
    return out.astype(x1.dtype)


if __name__ == "__main__":
    key = jax.random.PRNGKey(0)
    k1, k2, k3, k4 = jax.random.split(key, 4)

    # Case 1 (fused-kron path): x1 (N, C, H, W); x2 only matters via its size.
    x1 = jax.random.normal(k1, (2, 4, 8, 8), dtype=jnp.float32)
    x2 = jax.random.normal(k2, (2, 4, 18, 17), dtype=jnp.float32)
    out = up_forward(x1, target_h=x2.shape[2], target_w=x2.shape[3])
    out = jax.block_until_ready(out)
    ref = up_reference(x1, x2.shape[2], x2.shape[3])
    assert out.shape == (2, 4, 18, 17), out.shape
    assert jnp.allclose(out, ref, atol=2e-5, rtol=1e-5), float(jnp.max(jnp.abs(out - ref)))

    # Case 2 (fused-kron path, NC not a multiple of the 8-row block, asymmetric pad).
    x1b = jax.random.normal(k3, (1, 3, 8, 8), dtype=jnp.float32)
    outb = up_forward(x1b, target_h=17, target_w=16)
    outb = jax.block_until_ready(outb)
    refb = up_reference(x1b, 17, 16)
    assert outb.shape == (1, 3, 17, 16), outb.shape
    assert jnp.allclose(outb, refb, atol=2e-5, rtol=1e-5), float(jnp.max(jnp.abs(outb - refb)))

    # Case 3 (separable fallback path: kron matrix exceeds its VMEM cap).
    x1c = jax.random.normal(k4, (1, 2, 32, 40), dtype=jnp.float32)
    outc = up_forward(x1c, target_h=65, target_w=81)
    outc = jax.block_until_ready(outc)
    refc = up_reference(x1c, 65, 81)
    assert outc.shape == (1, 2, 65, 81), outc.shape
    assert jnp.allclose(outc, refc, atol=2e-5, rtol=1e-5), float(jnp.max(jnp.abs(outc - refc)))

    print("KERNEL_OK")
</pallas_src>

<mosaic_0001>
module attributes {stable_mosaic.version = 11 : i64} {
  func.func @_up_kron_kernel(%arg0: i32, %arg1: memref<8x64xf32, #tpu.memory_space<vmem>>, %arg2: memref<64x306xf32, #tpu.memory_space<vmem>>, %arg3: memref<8x306xf32, #tpu.memory_space<vmem>>) attributes {dimension_semantics = [#tpu.dimension_semantics<parallel>], iteration_bounds = array<i64: 1>, scalar_prefetch = 0 : i64, scratch_operands = 0 : i64, tpu.core_type = #tpu.core_type<tc>, window_params = [{transform_indices = @transform_0, window_bounds = array<i64: 8, 64>}, {pipeline_mode = #tpu.pipeline_mode<synchronous>, transform_indices = @transform_1, window_bounds = array<i64: 64, 306>}, {transform_indices = @transform_2, window_bounds = array<i64: 8, 306>}]} {
    %c0 = arith.constant 0 : index
    %c0_0 = arith.constant 0 : index
    %0 = vector.load %arg1[%c0, %c0_0] : memref<8x64xf32, #tpu.memory_space<vmem>>, vector<8x64xf32>
    %c0_1 = arith.constant 0 : index
    %c0_2 = arith.constant 0 : index
    %1 = vector.load %arg2[%c0_1, %c0_2] : memref<64x306xf32, #tpu.memory_space<vmem>>, vector<64x306xf32>
    %cst = arith.constant dense<0.000000e+00> : vector<8x306xf32>
    %2 = tpu.matmul %0, %1, %cst {dimension_numbers = #tpu.dot_dimension_numbers<[1], [0], [0], [1], [0, 0, 1, 1], [], []>} : vector<8x64xf32>, vector<64x306xf32>, vector<8x306xf32> -> vector<8x306xf32>
    %c0_3 = arith.constant 0 : index
    %c0_4 = arith.constant 0 : index
    %3 = vector.load %arg3[%c0_3, %c0_4] : memref<8x306xf32, #tpu.memory_space<vmem>>, vector<8x306xf32>
    tpu.vector_store %arg3[%c0_3, %c0_4], %2 {strides = array<i32>} : memref<8x306xf32, #tpu.memory_space<vmem>>, vector<8x306xf32>,
    return
  }
  func.func @transform_0(%arg0: i32) -> (i32, i32) {
    %c0_i32 = arith.constant 0 : i32
    %c0_i32_0 = arith.constant 0 : i32
    return %arg0, %c0_i32 : i32, i32
  }
  func.func @transform_1(%arg0: i32) -> (i32, i32) {
    %c0_i32 = arith.constant 0 : i32
    %c0_i32_0 = arith.constant 0 : i32
    %c0_i32_1 = arith.constant 0 : i32
    return %c0_i32, %c0_i32_0 : i32, i32
  }
  func.func @transform_2(%arg0: i32) -> (i32, i32) {
    %c0_i32 = arith.constant 0 : i32
    %c0_i32_0 = arith.constant 0 : i32
    return %arg0, %c0_i32 : i32, i32
  }
}

</mosaic_0001>

<bundles_post_ra>
// kernel: up_forward.1
= control target key start
LH: loop header
LB: loop body
LE: loop exit
PB: predicated region body
PF: predicated region fallthrough
CT: control target
= control target key end

     0   :  { %vm36_vm0 = vcmask 523264   ;;  %vm102_vm1 = vcmask 408576   ;;  %s210_s1 = inlined_call_operand.vmem [shape: f32[64,306], index: 1, kind: input, shape index: {}]   ;;  %s211_s0 = inlined_call_operand.vmem [shape: f32[8,64], index: 0, kind: input, shape index: {}]   ;;  %s212_s2 = inlined_call_operand.vmem [shape: f32[8,306], index: 2, kind: output, shape index: {}]  }
   0x1   :  { %v35_v0 = vld [vmem:[%s210_s1 + $0xb8] sm:$0xff]  ;;  %v32_v1 = vld [vmem:[%s210_s1 + $0xa0] sm:$0xff]  ;;  %v33_v2 = vld [vmem:[%s210_s1 + $0xa8] sm:$0xff] }
   0x2   :  { %88 = vmatpush.msra.mxu2 %v35_v0  ;;  %v34_v3 = vld [vmem:[%s210_s1 + $0xb0] sm:$0xff]  ;;  %v29_v4 = vld [vmem:[%s210_s1 + $0x88] sm:$0xff]  ;;  %48 = vmatpush.msra.mxu0 %v33_v2  ;;  %v31_v6 = vld [vmem:[%s210_s1 + $0x98] sm:$0xff] }
   0x3   :  { %68 = vmatpush.msra.mxu1 %v34_v3  ;;  %v30_v5 = vld [vmem:[%s210_s1 + $0x90] sm:$0xff]  ;;  %v27_v7 = vld [vmem:[%s210_s1 + $0x78] sm:$0xff]  ;;  %v28_v8 = vld [vmem:[%s210_s1 + $0x80] sm:$0xff] }
   0x4   :  { %89 = vmatpush.msra.mxu2 %v32_v1  ;;  %v26_v9 = vld [vmem:[%s210_s1 + $0x70] sm:$0xff]  ;;  %49 = vmatpush.msra.mxu0 %v30_v5  ;;  %v24_v10 = vld [vmem:[%s210_s1 + $0x60] sm:$0xff]  ;;  %v25_v11 = vld [vmem:[%s210_s1 + $0x68] sm:$0xff] }
   0x5   :  { %69 = vmatpush.msra.mxu1 %v31_v6  ;;  %v23_v12 = vld [vmem:[%s210_s1 + $0x58] sm:$0xff]  ;;  %v21_v13 = vld [vmem:[%s210_s1 + $0x48] sm:$0xff]  ;;  %v22_v14 = vld [vmem:[%s210_s1 + $0x50] sm:$0xff] }
   0x6   :  { %90 = vmatpush.msra.mxu2 %v29_v4  ;;  %50 = vmatpush.msra.mxu0 %v27_v7  ;;  %v20_v15 = vld [vmem:[%s210_s1 + $0x40] sm:$0xff]  ;;  %v18_v16 = vld [vmem:[%s210_s1 + $0x30] sm:$0xff]  ;;  %v19_v17 = vld [vmem:[%s210_s1 + $0x38] sm:$0xff] }
   0x7   :  { %70 = vmatpush.msra.mxu1 %v28_v8  ;;  %v17_v18 = vld [vmem:[%s210_s1 + $0x28] sm:$0xff]  ;;  %v15_v19 = vld [vmem:[%s210_s1 + $0x18] sm:$0xff]  ;;  %v16_v20 = vld [vmem:[%s210_s1 + $0x20] sm:$0xff] }
   0x8   :  { %91 = vmatpush.msra.mxu2 %v26_v9  ;;  %51 = vmatpush.msra.mxu0 %v24_v10  ;;  %v14_v21 = vld [vmem:[%s210_s1 + $0x10] sm:$0xff]  ;;  %v11_v22 = vld [vmem:[%s211_s0] sm:$0xff]  ;;  %v13_v24 = vld [vmem:[%s210_s1 + $0x8] sm:$0xff] }
   0x9   :  { %71 = vmatpush.msra.mxu1 %v25_v11  ;;  %v12_v23 = vld [vmem:[%s210_s1] sm:$0xff] }
   0xa   :  { %92 = vmatpush.msra.mxu2 %v23_v12  ;;  %52 = vmatpush.msra.mxu0 %v21_v13 }
   0xb   :  { %72 = vmatpush.msra.mxu1 %v22_v14 }
   0xc   :  { %93 = vmatpush.msra.mxu2 %v20_v15  ;;  %53 = vmatpush.msra.mxu0 %v18_v16 }
   0xd   :  { %73 = vmatpush.msra.mxu1 %v19_v17 }
   0xe   :  { %94 = vmatpush.msra.mxu2 %v17_v18  ;;  %54 = vmatpush.msra.mxu0 %v15_v19 }
   0xf   :  { %74 = vmatpush.msra.mxu1 %v16_v20 }
  0x10   :  { %95 = vmatpush.msra.mxu2 %v14_v21  ;;  %55 = vmatpush.msra.mxu0 %v12_v23 }
  0x11   :  { %110 = vmatmul.msk.f32.vlgmr.msra.gmra.mxu2 %vm36_vm0, %v11_v22  ;;  %75 = vmatpush.msra.mxu1 %v13_v24 }
  0x12   :  { %108 = vmatmul.msk.f32.vlgmr.msra.gmra.mxu0 %vm36_vm0, %v11_v22  ;;  %109 = vmatmul.msk.f32.vlgmr.msra.gmra.mxu1 %vm36_vm0, %v11_v22 }
  0x8f   :  { %v57_v25 = vpop.f32.mrf.mxu0  ;;  %v77_v26 = vpop.f32.mrf.mxu1 }
  0x90   :  { %100 = vst [vmem:[%s212_s2] sm:$0xff] %v57_v25 }
  0x91   :  { %101 = vst [vmem:[%s212_s2 + $0x8] sm:$0xff] %v77_v26 }
  0x94   :  { %v97_v27 = vpop.f32.mrf.mxu2 }
  0x95   :  { %103 = vst.msk [vmem:[%s212_s2 + $0x10] sm:$0xff] %vm102_vm1, %v97_v27 }

</bundles_post_ra>
